<compile_context>
chip_gen: v7x
topology: tpu7x:2x2x1
jax: 0.10.0
libtpu: 0.0.40
codegen_flags: <defaults>
</compile_context>

<pallas_src>
import functools

import jax
import jax.numpy as jnp
from jax.experimental import pallas as pl
from jax.experimental.pallas import tpu as pltpu


# ----------------------------- fused Pallas kernel ---------------------------

def _fused_ln_linear_residual_kernel(
    x_ref,       # (tr, h)  row block of x: LayerNorm input AND residual source
    a_ref,       # (1, h)   LayerNorm gain  a_2
    b_ref,       # (1, h)   LayerNorm bias  b_2
    w_ref,       # (h, tn)  linear weight tile (matmul dtype, e.g. bf16)
    bias_ref,    # (1, tn)  linear bias tile (f32)
    out_ref,     # (tr, tn) x + (norm(x) @ W + bias)
    y_ref,       # (tr, h)  norm(x)  (aux output of the sublayer)
    y_scratch,   # (tr, h)  VMEM scratch holding norm(x) in the matmul dtype
    *, eps, tn, single_n_block,
):
    j = pl.program_id(1)

    # LayerNorm is hoisted out of the N loop: compute it (and write the aux output)
    # only on the first N tile of this row block, keep norm(x) resident in scratch.
    @pl.when(j == 0)
    def _layer_norm():
        x = x_ref[...].astype(jnp.float32)
        h = x.shape[-1]
        # PyTorch LayerNorm above uses torch.std (unbiased, N-1 denominator) and
        # divides by (std + eps), NOT sqrt(var + eps).
        mean = jnp.mean(x, axis=-1, keepdims=True)
        centered = x - mean
        var_unbiased = jnp.sum(centered * centered, axis=-1, keepdims=True) / (h - 1)
        inv = 1.0 / (jnp.sqrt(var_unbiased) + eps)      # exact (one scalar per row)
        y = (a_ref[...].astype(jnp.float32) * centered * inv
             + b_ref[...].astype(jnp.float32))
        y_ref[...] = y.astype(y_ref.dtype)              # aux: norm(x)
        y_scratch[...] = y.astype(y_scratch.dtype)      # feed to the MXU (bf16)

    acc = jnp.dot(y_scratch[...], w_ref[...],
                  preferred_element_type=jnp.float32)   # MXU, f32 accumulate
    acc = acc + bias_ref[...].astype(jnp.float32)

    # dropout: inference mode -> identity; fuse the residual add here.
    # n == h (asserted in the wrapper), so the residual columns are already resident
    # in x_ref -- no second HBM read of x.
    if single_n_block:
        res = x_ref[...]
    else:
        col0 = pl.multiple_of(j * tn, tn)
        res = x_ref[:, pl.ds(col0, tn)]
    acc = acc + res.astype(jnp.float32)
    out_ref[...] = acc.astype(out_ref.dtype)


# ----------------------------- wrapper ---------------------------------------

def _round_up(v, m):
    return ((v + m - 1) // m) * m


def _cdiv(a, b):
    return (a + b - 1) // b


def _pick_row_tile(r, max_row_tile=512):
    if r <= 8:
        return r
    # Guarantee at least 2 row blocks so both v7x TensorCores get work on the
    # "parallel" grid axis; keep the tile a multiple of 8 sublanes.
    tr = _round_up(_cdiv(r, 2), 8)
    return min(max_row_tile, tr)


def _pick_n_tile(n, max_n_tile=512):
    # Lane-dense N tiles; prefer >= 256 (v6e/v7x MXU is 256 wide).
    if n % 128 != 0 or n <= max_n_tile:
        # TODO(synk): for large n that is not a multiple of 128, pad N instead of
        # taking the whole dimension into VMEM.
        return n
    for t in (512, 384, 256, 128):
        if t <= max_n_tile and n % t == 0:
            return t
    return n


def fused_sublayer_linear(x2d, a_2, b_2, w, bias, eps,
                          *, max_row_tile=512, max_n_tile=512,
                          matmul_dtype=jnp.bfloat16):
    """Single fused pallas_call computing:
         y   = LayerNorm(x)              (torch-style: unbiased std, divide by std+eps)
         out = x + (y @ W + bias)        (dropout = identity, eval mode)
       Returns (out, y) over 2-D rows x hidden."""
    r, h = x2d.shape
    hw, n = w.shape
    assert hw == h and n == h, "residual connection requires the sublayer output dim == h"
    dtype = x2d.dtype

    tr = _pick_row_tile(r, max_row_tile)
    tn = _pick_n_tile(n, max_n_tile)
    grid = (_cdiv(r, tr), n // tn)          # ragged row edge handled by Pallas masking
    single_n_block = (grid[1] == 1)

    # bf16 weight halves DMA + VMEM; accumulation stays f32 in the kernel.
    w_mm = w.astype(matmul_dtype)

    # VMEM budget: double-buffered ins/outs + single scratch, capped for v7x (64 MiB/TC).
    isz_x = jnp.dtype(dtype).itemsize
    isz_w = jnp.dtype(matmul_dtype).itemsize
    est = 2 * (tr * h * isz_x            # x row block
               + h * tn * isz_w          # weight tile
               + tn * 4 + 2 * h * 4      # bias + a_2 + b_2
               + tr * tn * isz_x         # out block
               + tr * h * isz_x)         # y block
    est += tr * h * isz_w                # scratch (single-buffered)
    vmem_limit = int(min(48 * 1024 * 1024, max(32 * 1024 * 1024, 2 * est)))

    out2d, y2d = pl.pallas_call(
        functools.partial(_fused_ln_linear_residual_kernel,
                          eps=eps, tn=tn, single_n_block=single_n_block),
        out_shape=(
            jax.ShapeDtypeStruct((r, n), dtype),
            jax.ShapeDtypeStruct((r, h), dtype),
        ),
        grid=grid,
        in_specs=[
            pl.BlockSpec((tr, h), lambda i, j: (i, 0)),    # x row block (LN + residual)
            pl.BlockSpec((1, h), lambda i, j: (0, 0)),     # a_2
            pl.BlockSpec((1, h), lambda i, j: (0, 0)),     # b_2
            pl.BlockSpec((h, tn), lambda i, j: (0, j)),    # weight tile (streamed over N)
            pl.BlockSpec((1, tn), lambda i, j: (0, j)),    # bias tile
        ],
        out_specs=(
            pl.BlockSpec((tr, tn), lambda i, j: (i, j)),   # out
            pl.BlockSpec((tr, h), lambda i, j: (i, 0)),    # y = norm(x) (aux)
        ),
        scratch_shapes=[pltpu.VMEM((tr, h), matmul_dtype)],
        compiler_params=pltpu.CompilerParams(
            # rows shard across TensorCores (v7x megacore); the N axis revisits the
            # y block, so it stays "arbitrary".
            dimension_semantics=("parallel", "arbitrary"),
            vmem_limit_bytes=vmem_limit,
        ),
    )(x2d, a_2.reshape(1, h), b_2.reshape(1, h), w_mm, bias.reshape(1, n))

    return out2d, y2d


def sublayer_connection_forward(x, a_2, b_2, w, bias, eps=1e-7):
    """Mirrors SublayerConnection.forward(x, sublayer) with a Linear sublayer that
    returns a 2-tuple (Linear(y), y):

        returned_value = sublayer(norm(x))
        return (x + dropout(returned_value[0]), returned_value[1])
    """
    b, s, h = x.shape
    x2d = x.reshape(b * s, h)
    out2d, y2d = fused_sublayer_linear(x2d, a_2, b_2, w, bias, eps)
    return out2d.reshape(b, s, h), y2d.reshape(b, s, h)


# ----------------------------- reference (pure JAX) --------------------------

def _reference(x, a_2, b_2, w, bias, eps=1e-7):
    mean = jnp.mean(x, axis=-1, keepdims=True)
    std = jnp.std(x, axis=-1, keepdims=True, ddof=1)
    y = a_2 * (x - mean) / (std + eps) + b_2
    out0 = jnp.einsum("bsh,hn->bsn", y, w) + bias
    return x + out0, y


# ----------------------------- main -------------------------------------------

if __name__ == "__main__":
    key = jax.random.PRNGKey(0)
    kx, kw, kb = jax.random.split(key, 3)

    # Small shapes consistent with the module; d_model=128 keeps the lane dim dense.
    B, S, D_MODEL = 2, 8, 128
    x = jax.random.normal(kx, (B, S, D_MODEL), dtype=jnp.float32)

    # LayerNorm params, initialized exactly as the module's __init__.
    a_2 = jnp.ones((D_MODEL,), dtype=jnp.float32)
    b_2 = jnp.zeros((D_MODEL,), dtype=jnp.float32)

    # Deterministic synthetic Linear sublayer (returns a 2-tuple like the module expects).
    w = jax.random.normal(kw, (D_MODEL, D_MODEL), dtype=jnp.float32) * 0.05
    bias = jax.random.normal(kb, (D_MODEL,), dtype=jnp.float32) * 0.05

    out, aux = sublayer_connection_forward(x, a_2, b_2, w, bias, eps=1e-7)
    jax.block_until_ready(out)
    jax.block_until_ready(aux)

    ref_out, ref_aux = _reference(x, a_2, b_2, w, bias, eps=1e-7)
    assert out.shape == (B, S, D_MODEL) and aux.shape == (B, S, D_MODEL)
    # aux (norm(x)) is computed fully in f32 -> tight tolerance.
    assert jnp.allclose(aux, ref_aux, atol=1e-4, rtol=1e-4)
    # out goes through the bf16 MXU path (bf16 inputs, f32 accumulate) -> looser tolerance.
    assert jnp.allclose(out, ref_out, atol=1e-2, rtol=1e-2)

    print("KERNEL_OK")
</pallas_src>

<mosaic_0001>
module attributes {stable_mosaic.version = 11 : i64} {
  func.func @_fused_ln_linear_residual_kernel(%arg0: i32, %arg1: i32, %arg2: memref<8x128xf32, #tpu.memory_space<vmem>>, %arg3: memref<1x128xf32, #tpu.memory_space<vmem>>, %arg4: memref<1x128xf32, #tpu.memory_space<vmem>>, %arg5: memref<128x128xbf16, #tpu.memory_space<vmem>>, %arg6: memref<1x128xf32, #tpu.memory_space<vmem>>, %arg7: memref<8x128xf32, #tpu.memory_space<vmem>>, %arg8: memref<8x128xf32, #tpu.memory_space<vmem>>, %arg9: memref<8x128xbf16, #tpu.memory_space<vmem>>) attributes {dimension_semantics = [#tpu.dimension_semantics<parallel>, #tpu.dimension_semantics<arbitrary>], iteration_bounds = array<i64: 2, 1>, scalar_prefetch = 0 : i64, scratch_operands = 1 : i64, tpu.core_type = #tpu.core_type<tc>, window_params = [{transform_indices = @transform_0, window_bounds = array<i64: 8, 128>}, {pipeline_mode = #tpu.pipeline_mode<synchronous>, transform_indices = @transform_1, window_bounds = array<i64: 1, 128>}, {pipeline_mode = #tpu.pipeline_mode<synchronous>, transform_indices = @transform_2, window_bounds = array<i64: 1, 128>}, {transform_indices = @transform_3, window_bounds = array<i64: 128, 128>}, {transform_indices = @transform_4, window_bounds = array<i64: 1, 128>}, {transform_indices = @transform_5, window_bounds = array<i64: 8, 128>}, {transform_indices = @transform_6, window_bounds = array<i64: 8, 128>}]} {
    %c0_i32 = arith.constant 0 : i32
    %0 = arith.cmpi eq, %arg1, %c0_i32 : i32
    %1 = arith.extui %0 : i1 to i32
    %c0_i32_0 = arith.constant 0 : i32
    %2 = arith.cmpi ne, %1, %c0_i32_0 : i32
    scf.if %2 {
      %c0_10 = arith.constant 0 : index
      %c0_11 = arith.constant 0 : index
      %12 = vector.load %arg2[%c0_10, %c0_11] : memref<8x128xf32, #tpu.memory_space<vmem>>, vector<8x128xf32>
      %cst_12 = arith.constant dense<0.000000e+00> : vector<8xf32>
      %13 = vector.multi_reduction <add>, %12, %cst_12 [1] : vector<8x128xf32> to vector<8xf32>
      %14 = vector.shape_cast %13 : vector<8xf32> to vector<8x1xf32>
      %cst_13 = arith.constant 1.280000e+02 : f32
      %15 = vector.broadcast %cst_13 : f32 to vector<8x1xf32>
      %16 = arith.divf %14, %15 : vector<8x1xf32>
      %17 = vector.broadcast %16 : vector<8x1xf32> to vector<8x128xf32>
      %18 = arith.subf %12, %17 : vector<8x128xf32>
      %19 = arith.mulf %18, %18 : vector<8x128xf32>
      %cst_14 = arith.constant dense<0.000000e+00> : vector<8xf32>
      %20 = vector.multi_reduction <add>, %19, %cst_14 [1] : vector<8x128xf32> to vector<8xf32>
      %21 = vector.shape_cast %20 : vector<8xf32> to vector<8x1xf32>
      %cst_15 = arith.constant 1.270000e+02 : f32
      %22 = vector.broadcast %cst_15 : f32 to vector<8x1xf32>
      %23 = arith.divf %21, %22 : vector<8x1xf32>
      %24 = math.sqrt %23 : vector<8x1xf32>
      %cst_16 = arith.constant 1.000000e-07 : f32
      %25 = vector.broadcast %cst_16 : f32 to vector<8x1xf32>
      %26 = arith.addf %24, %25 : vector<8x1xf32>
      %cst_17 = arith.constant 1.000000e+00 : f32
      %27 = vector.broadcast %cst_17 : f32 to vector<8x1xf32>
      %28 = arith.divf %27, %26 : vector<8x1xf32>
      %c0_18 = arith.constant 0 : index
      %c0_19 = arith.constant 0 : index
      %29 = vector.load %arg3[%c0_18, %c0_19] : memref<1x128xf32, #tpu.memory_space<vmem>>, vector<1x128xf32>
      %30 = vector.broadcast %29 : vector<1x128xf32> to vector<8x128xf32>
      %31 = arith.mulf %30, %18 : vector<8x128xf32>
      %32 = vector.broadcast %28 : vector<8x1xf32> to vector<8x128xf32>
      %33 = arith.mulf %31, %32 : vector<8x128xf32>
      %c0_20 = arith.constant 0 : index
      %c0_21 = arith.constant 0 : index
      %34 = vector.load %arg4[%c0_20, %c0_21] : memref<1x128xf32, #tpu.memory_space<vmem>>, vector<1x128xf32>
      %35 = vector.broadcast %34 : vector<1x128xf32> to vector<8x128xf32>
      %36 = arith.addf %33, %35 : vector<8x128xf32>
      %c0_22 = arith.constant 0 : index
      %c0_23 = arith.constant 0 : index
      %37 = vector.load %arg8[%c0_22, %c0_23] : memref<8x128xf32, #tpu.memory_space<vmem>>, vector<8x128xf32>
      tpu.vector_store %arg8[%c0_22, %c0_23], %36 {strides = array<i32>} : memref<8x128xf32, #tpu.memory_space<vmem>>, vector<8x128xf32>,
      %38 = arith.truncf %36 : vector<8x128xf32> to vector<8x128xbf16>
      %c0_24 = arith.constant 0 : index
      %c0_25 = arith.constant 0 : index
      %39 = vector.load %arg9[%c0_24, %c0_25] : memref<8x128xbf16, #tpu.memory_space<vmem>>, vector<8x128xbf16>
      tpu.vector_store %arg9[%c0_24, %c0_25], %38 {strides = array<i32>} : memref<8x128xbf16, #tpu.memory_space<vmem>>, vector<8x128xbf16>,
    } else {
    }
    %c0 = arith.constant 0 : index
    %c0_1 = arith.constant 0 : index
    %3 = vector.load %arg9[%c0, %c0_1] : memref<8x128xbf16, #tpu.memory_space<vmem>>, vector<8x128xbf16>
    %c0_2 = arith.constant 0 : index
    %c0_3 = arith.constant 0 : index
    %4 = vector.load %arg5[%c0_2, %c0_3] : memref<128x128xbf16, #tpu.memory_space<vmem>>, vector<128x128xbf16>
    %cst = arith.constant dense<0.000000e+00> : vector<8x128xf32>
    %5 = tpu.matmul %3, %4, %cst {dimension_numbers = #tpu.dot_dimension_numbers<[1], [0], [0], [1], [0, 0, 1, 1], [], []>} : vector<8x128xbf16>, vector<128x128xbf16>, vector<8x128xf32> -> vector<8x128xf32>
    %c0_4 = arith.constant 0 : index
    %c0_5 = arith.constant 0 : index
    %6 = vector.load %arg6[%c0_4, %c0_5] : memref<1x128xf32, #tpu.memory_space<vmem>>, vector<1x128xf32>
    %7 = vector.broadcast %6 : vector<1x128xf32> to vector<8x128xf32>
    %8 = arith.addf %5, %7 : vector<8x128xf32>
    %c0_6 = arith.constant 0 : index
    %c0_7 = arith.constant 0 : index
    %9 = vector.load %arg2[%c0_6, %c0_7] : memref<8x128xf32, #tpu.memory_space<vmem>>, vector<8x128xf32>
    %10 = arith.addf %8, %9 : vector<8x128xf32>
    %c0_8 = arith.constant 0 : index
    %c0_9 = arith.constant 0 : index
    %11 = vector.load %arg7[%c0_8, %c0_9] : memref<8x128xf32, #tpu.memory_space<vmem>>, vector<8x128xf32>
    tpu.vector_store %arg7[%c0_8, %c0_9], %10 {strides = array<i32>} : memref<8x128xf32, #tpu.memory_space<vmem>>, vector<8x128xf32>,
    return
  }
  func.func @transform_0(%arg0: i32, %arg1: i32) -> (i32, i32) {
    %c0_i32 = arith.constant 0 : i32
    %c0_i32_0 = arith.constant 0 : i32
    return %arg0, %c0_i32 : i32, i32
  }
  func.func @transform_1(%arg0: i32, %arg1: i32) -> (i32, i32) {
    %c0_i32 = arith.constant 0 : i32
    %c0_i32_0 = arith.constant 0 : i32
    %c0_i32_1 = arith.constant 0 : i32
    return %c0_i32, %c0_i32_0 : i32, i32
  }
  func.func @transform_2(%arg0: i32, %arg1: i32) -> (i32, i32) {
    %c0_i32 = arith.constant 0 : i32
    %c0_i32_0 = arith.constant 0 : i32
    %c0_i32_1 = arith.constant 0 : i32
    return %c0_i32, %c0_i32_0 : i32, i32
  }
  func.func @transform_3(%arg0: i32, %arg1: i32) -> (i32, i32) {
    %c0_i32 = arith.constant 0 : i32
    %c0_i32_0 = arith.constant 0 : i32
    return %c0_i32, %arg1 : i32, i32
  }
  func.func @transform_4(%arg0: i32, %arg1: i32) -> (i32, i32) {
    %c0_i32 = arith.constant 0 : i32
    %c0_i32_0 = arith.constant 0 : i32
    return %c0_i32, %arg1 : i32, i32
  }
  func.func @transform_5(%arg0: i32, %arg1: i32) -> (i32, i32) {
    %c0_i32 = arith.constant 0 : i32
    return %arg0, %arg1 : i32, i32
  }
  func.func @transform_6(%arg0: i32, %arg1: i32) -> (i32, i32) {
    %c0_i32 = arith.constant 0 : i32
    %c0_i32_0 = arith.constant 0 : i32
    return %arg0, %c0_i32 : i32, i32
  }
}

</mosaic_0001>

<bundles_post_ra>
// kernel: tpu_custom_call.1
= control target key start
LH: loop header
LB: loop body
LE: loop exit
PB: predicated region body
PF: predicated region fallthrough
CT: control target
= control target key end

     0   :  { %s1291_s0 = inlined_call_operand.hbm [shape: f32[16,128], index: 0, kind: input, shape index: {}]   ;;  %s1292_s1 = inlined_call_operand.vmem [shape: f32[1,128], index: 1, kind: input, shape index: {}]   ;;  %s1293_s2 = inlined_call_operand.vmem [shape: f32[1,128], index: 2, kind: input, shape index: {}]   ;;  %s1294_s3 = inlined_call_operand.hbm [shape: bf16[128,128], index: 3, kind: input, shape index: {}]   ;;  %s1295_s4 = inlined_call_operand.vmem [shape: f32[1,128], index: 4, kind: input, shape index: {}]   ;;  %s1296_s5 = inlined_call_operand.hbm [shape: f32[16,128], index: 5, kind: output, shape index: {0}]   ;;  %s1297_s6 = inlined_call_operand.hbm [shape: f32[16,128], index: 6, kind: output, shape index: {1}]  }
   0x1   :  { %1302 = sst [smem:[#allocation15_spill]] %s1294_s3 }
   0x2   :  { %12 = vsyncpa [#allocation4], 0 }
   0x3   :  { %14 = vsyncpa [#allocation4 + $0x1], 0 }
   0x4   :  { %15 = vsyncpa [#allocation7], 0 }
   0x5   :  { %16 = vsyncpa [#allocation5], 0 }
   0x6   :  { %18 = vsyncpa [#allocation5 + $0x1], 0 }
   0x7   :  { %19 = vsyncpa [#allocation10], 0 }
   0x8   :  { %21 = vsyncpa [#allocation10 + $0x1], 0  ;;  %s1031_s21 = smov 0   ;;  %s1033_s22 = smov 0  }
   0x9   :  { %s1035_s23 = smov 0   ;;  %s1037_s24 = smov 0  }
   0xa   :  { %s1039_s25 = smov 0   ;;  %s1041_s26 = smov 0  }
   0xb LB: > { %s657_s27 = sadd.s32 4294967295, %s986_s26   ;;  %s658_s28 = sadd.s32 4294967294, %s986_s26   ;;  %s986_s26 = sphi %s1041_s26, %s27_s26   ;;  %s982_s25 = sphi %s1039_s25, %s1323_s25   ;;  %s978_s24 = sphi %s1037_s24, %s1322_s24   ;;  %s974_s23 = sphi %s1035_s23, %s1321_s23   ;;  %s970_s22 = sphi %s1033_s22, %s1320_s22   ;;  %s966_s21 = sphi %s1031_s21, %s1319_s21  }
   0xc   : > { %p59_p0 = scmp.ne.s32.totalorder %s970_s22, %s966_s21  ;;  %p1065_p1 = scmp.eq.s32.totalorder %s657_s27, 0 }
   0xd   : > { %p1069_p2 = scmp.eq.s32.totalorder %s657_s27, 1  ;;  %p185_p3 = scmp.eq.s32.totalorder %s658_s28, 1 }
   0xe   : > { %s1303_s29 = scalar_select %p1065_p1, 1, 0 }
   0xf   : > { %s1304_s30 = scalar_select %p1069_p2, 1, 0 }
  0x10   : > { %p1075_p4 = por %p1065_p1, %p59_p0  ;;  %p659_p5 = scmp.ge.s32.totalorder %s986_s26, 1 }
  0x11   : > { %p1080_p6 = por %p185_p3, %p59_p0  ;;  %p218_p7 = scmp.lt.s32.totalorder %s986_s26, 3 }
  0x12   : > { %s1305_s7 = scalar_select %p1075_p4, 1, 0 }
  0x13   : > { %s1306_s8 = scalar_select %p1080_p6, 1, 0 }
  0x14   : > { %p1085_p8 = pnand %p659_p5, %p218_p7  ;;  %s988_s10 = smov [#allocation6]  }
  0x15   : > { %s238_s11 = sshll.u32 %s988_s10, 4  ;;  %s39_s13 = sadd.s32 1, %s982_s25  ;;  %s239_s11 = int_to_ptr.vmem [resolvable:$true] %s238_s11 }
  0x16   : > { %s1307_s9 = scalar_select %p1085_p8, 1, 0 }
  0x17   : > { %p726_p9 = pneg %p1085_p8  ;;  %s1309_s3 = sld [smem:[#allocation15_spill]] }
  0x19   : > { %p1094_p11 = pnand %p726_p9, %p1065_p1 }
  0x1b   : > { %p812_p13 = pneg %p1094_p11 }
  0x1d   : > { %s810_s16 = scalar_lea.hbm %s1309_s3, 1024 }
  0x1e   : > { %p811_p12 = scmp.ne.s32.totalorder %s1309_s3, %s810_s16  ;;  %p817_p5 = scmp.lt.u32.totalorder %s810_s16, %s1309_s3 }
  0x20   : > { %p813_p0 = pnand %p812_p13, %p811_p12 }
  0x22   : > { %p814_p3 = pneg %p813_p0 }
  0x24   : > { %p819_p7 = pnand %p817_p5, %p814_p3 }
  0x26   : > { %822 = shalt.err (!%p819_p7)
}
  0x27   : > { %s823_s27 = scalar_lea.vmem %s239_s11, 1024  ;;  %p831_p1 = scmp.lt.s32.totalorder %s239_s11, %s239_s11 }
  0x28   : > { %p824_p9 = scmp.ne.s32.totalorder %s239_s11, %s823_s27  ;;  %p832_p4 = scmp.lt.s32.totalorder %s823_s27, %s823_s27 }
  0x2a   : > { %p826_p10 = pnand %p824_p9, %p812_p13  ;;  %p833_p8 = por %p832_p4, %p831_p1 }
  0x2c   : > { %p827_p6 = pneg %p826_p10 }
  0x2e   : > { %p834_p2 = pnand %p833_p8, %p827_p6 }
  0x30   : > { %837 = shalt.err (!%p834_p2)
}
  0x31   : > { %s989_s28 = smov 64   ;;  %s990_s10 = smov 4  }
  0x32   : > { %729 = dma.hbm_to_vmem [thread:$0]  (!%p1094_p11), %s1309_s3, 1024, %s239_s11, [#allocation7], %s989_s28, %s989_s28, %s990_s10  }
  0x33   : > { %p41_p1 = scmp.ge.s32.totalorder %s39_s13, 2  ;;  %s46_s16 = sadd.s32 1, %s974_s23 }
  0x34   : > { %p53_p2 = scmp.ne.s32.totalorder %s974_s23, %s970_s22  ;;  %p54_p4 = scmp.eq.s32.totalorder %s986_s26, 0 }
  0x35   : > { %s1325_s13 = smov (%p41_p1, %s39_s13), 0  ;;  %p1311_p8 = scmp.ne.s32.totalorder %s1304_s30, 0 }
  0x36   : > { %p1121_p6 = por %p54_p4, %p53_p2  ;;  %s43_s12 = ssub.s32 %s982_s25, %s1325_s13 }
  0x37   : > { %p1127_p10 = por %p1311_p8, %p53_p2  ;;  %p742_p12 = scmp.lt.s32.totalorder %s986_s26, 2 }
  0x38   : > { %p44_p11 = scmp.eq.s32.totalorder %s43_s12, 0  ;;  %s258_s11 = sand.u32 1, %s974_s23  }
  0x39   : > { %s663_s19 = sshll.u32 %s258_s11, 3  ;;  %s664_s27 = sshll.u32 %s982_s25, 7 }
  0x3a   : > { %s1136_s20 = scalar_select %p44_p11, %s974_s23, %s46_s16  }
  0x3b   : > { %s1142_s14 = scalar_lea.hbm %s1291_s0, %s664_s27  ;;  %s262_s30 = scalar_lea.vmem [#allocation3], %s663_s19 }
  0x3c   : > { %s269_s15 = sshll.u32 %s262_s30, 4  ;;  %p1148_p13 = pnand %p742_p12, %p1121_p6  ;;  %s1144_s15 = int_to_ptr.vmem [resolvable:$true] %s269_s15 }
  0x3d   : > { %s259_s16 = scalar_lea.sflag [#allocation4], %s258_s11  ;;  %s838_s3 = scalar_lea.hbm %s1142_s14, 128 }
  0x3e   : > { %p839_p0 = scmp.ne.s32.totalorder %s1142_s14, %s838_s3  ;;  %p840_p3 = pneg %p1148_p13 }
  0x3f   : > { %s843_s28 = scalar_lea.hbm %s1291_s0, 256  ;;  %p844_p9 = scmp.lt.u32.totalorder %s1142_s14, %s1291_s0 }
  0x40   : > { %p841_p5 = pnand %p840_p3, %p839_p0  ;;  %p845_p1 = scmp.lt.u32.totalorder %s843_s28, %s838_s3 }
  0x41   : > { %p847_p4 = scmp.lt.u32.totalorder %s838_s3, %s1142_s14 }
  0x42   : > { %p842_p7 = pneg %p841_p5  ;;  %p846_p2 = por %p845_p1, %p844_p9 }
  0x44   : > { %p848_p6 = por %p847_p4, %p846_p2 }
  0x46   : > { %p849_p8 = pnand %p848_p6, %p842_p7 }
  0x48   : > { %852 = shalt.err (!%p849_p8)
}
  0x49   : > { %s853_s11 = scalar_lea.vmem %s1144_s15, 128  ;;  %s991_s30 = smov [#allocation3]  }
  0x4a   : > { %p854_p12 = scmp.ne.s32.totalorder %s1144_s15, %s853_s11  ;;  %s858_s19 = sshll.u32 %s991_s30, 4  ;;  %s859_s19 = int_to_ptr.vmem [resolvable:$false] %s858_s19 }
  0x4b   : > { %s860_s27 = scalar_lea.vmem %s859_s19, 256  ;;  %p861_p5 = scmp.lt.s32.totalorder %s1144_s15, %s859_s19 }
  0x4c   : > { %p856_p11 = pnand %p854_p12, %p840_p3  ;;  %p862_p9 = scmp.lt.s32.totalorder %s860_s27, %s853_s11 }
  0x4e   : > { %p857_p0 = pneg %p856_p11  ;;  %p863_p1 = por %p862_p9, %p861_p5 }
  0x50   : > { %p864_p2 = pnand %p863_p1, %p857_p0 }
  0x52   : > { %867 = shalt.err (!%p864_p2)
}
  0x53   : > { %733 = dma.hbm_to_vmem [thread:$0]  (!%p1148_p13), %s1142_s14, 128, %s1144_s15, %s259_s16  }
  0x54   : > { %p1314_p7 = scmp.ne.s32.totalorder %s1307_s9, 0 }
  0x55   : > { %s1180_s3 = sand.u32 (!%p1314_p7), 1, %s970_s22   ;;  %p1315_p3 = scmp.ne.s32.totalorder (!%p1314_p7), %s1305_s7, 0 }
  0x56   : > { %278 = sbr.rel (%p1314_p7) target bundleno = 662 (0x296), region = 40  ;;  %s1183_s28 = sshll.u32 (!%p1314_p7), %s1180_s3, 3 }
  0x57   : > { %s281_s17 = scalar_lea.sflag (!%p1314_p7), [#allocation4], %s1180_s3  ;;  %s284_s10 = scalar_lea.vmem (!%p1314_p7), [#allocation3], %s1183_s28 }
  0x5d   : > { %949 = dma.done.wait (%p1315_p3), %s281_s17, 128  }
  0x5e   : > { %951 = vsyncadd (%p1315_p3), %s281_s17, 4294967168  ;;  %p1316_p13 = scmp.ne.s32.totalorder %s1303_s29, 0 }
  0x60   : > { %953 = dma.done.wait (%p1316_p13), [#allocation7], 1024  }
  0x61   : > { %955 = vsyncadd (%p1316_p13), [#allocation7], 4294966272  ;;  %v1195_v0 = vld [vmem:[%s284_s10] sm:$0xff]  ;;  %v798_v5 = vld [vmem:[#allocation6] sm:$0xff]   ;;  %v992_v6 = vmov 0.0   ;;  %vm993_vm0 = vmmov 0  }
  0x62   : > { %334 = vadd.xlane.f32.xlu0 %v1195_v0  ;;  %696 = vmatprep.subr.bf16.mxu0 %v992_v6  ;;  %v799_v7 = vld [vmem:[#allocation6 + $0x8] sm:$0xff]   ;;  %v800_v8 = vld [vmem:[#allocation6 + $0x10] sm:$0xff]   ;;  %v801_v9 = vld [vmem:[#allocation6 + $0x18] sm:$0xff]   ;;  %s324_s15 = scalar_lea.vmem [#allocation9], %s1183_s28  ;;  %s683_s12 = sshll.u32 %s978_s24, 7 }
  0x63   : > { %697 = vmatpush3.bf16.msra.mxu0 %v798_v5  ;;  %v802_v10 = vld [vmem:[#allocation6 + $0x20] sm:$0xff]   ;;  %v803_v11 = vld [vmem:[#allocation6 + $0x28] sm:$0xff]   ;;  %v804_v12 = vld [vmem:[#allocation6 + $0x30] sm:$0xff]   ;;  %712 = vmatprep.mubr.msk.bf16.mxu0 %vm993_vm0, %v992_v6  ;;  %s1212_s30 = scalar_lea.hbm %s1297_s6, %s683_s12  ;;  %s522_s19 = sshll.u32 %s324_s15, 4  ;;  %s523_s19 = int_to_ptr.vmem [resolvable:$true] %s522_s19 }
  0x64   : > { %698 = vmatprep.subr.bf16.mxu0 %v992_v6  ;;  %v805_v13 = vld [vmem:[#allocation6 + $0x38] sm:$0xff]   ;;  %v670_v22 = vld [vmem:[%s1292_s1] ss:$0 sm:$0xff]  ;;  %s495_s27 = scalar_lea.sflag [#allocation10], %s1180_s3  ;;  %s868_s17 = scalar_lea.vmem %s523_s19, 128 }
  0x65   : > { %v671_v25 = vld [vmem:[%s1293_s2] ss:$0 sm:$0xff]  ;;  %p869_p4 = scmp.ne.s32.totalorder %s523_s19, %s868_s17  ;;  %s994_s10 = smov [#allocation9]  }
  0x66   : > { %s872_s29 = sshll.u32 %s994_s10, 4  ;;  %s873_s29 = int_to_ptr.vmem [resolvable:$false] %s872_s29 }
  0x67   : > { %699 = vmatpush3.bf16.msra.mxu0 %v799_v7  ;;  %p870_p6 = pnand %p869_p4, %p1127_p10  ;;  %s874_s7 = scalar_lea.vmem %s873_s29, 256 }
  0x68   : > { %700 = vmatprep.subr.bf16.mxu0 %v992_v6  ;;  %p875_p12 = scmp.lt.s32.totalorder %s523_s19, %s873_s29  ;;  %p876_p11 = scmp.lt.s32.totalorder %s874_s7, %s868_s17 }
  0x69   : > { %p871_p8 = pneg %p870_p6 }
  0x6a   : > { %p877_p0 = por %p876_p11, %p875_p12 }
  0x6b   : > { %701 = vmatpush3.bf16.msra.mxu0 %v800_v8 }
  0x6c   : > { %702 = vmatprep.subr.bf16.mxu0 %v992_v6  ;;  %p878_p5 = pnand %p877_p0, %p871_p8 }
  0x6f   : > { %703 = vmatpush3.bf16.msra.mxu0 %v801_v9 }
  0x70   : > { %704 = vmatprep.subr.bf16.mxu0 %v992_v6 }
  0x73   : > { %705 = vmatpush3.bf16.msra.mxu0 %v802_v10 }
  0x74   : > { %706 = vmatprep.subr.bf16.mxu0 %v992_v6 }
  0x77   : > { %707 = vmatpush3.bf16.msra.mxu0 %v803_v11 }
  0x78   : > { %708 = vmatprep.subr.bf16.mxu0 %v992_v6 }
  0x7b   : > { %709 = vmatpush3.bf16.msra.mxu0 %v804_v12 }
  0x7c   : > { %710 = vmatprep.subr.bf16.mxu0 %v992_v6 }
  0x7f   : > { %711 = vmatpush3.bf16.msra.mxu0 %v805_v13 }
  0xef   : > { %v335_v1 = vpop.xlane.xlu0 %334 }
  0xf0   : > { %v337_v2 = vmul.f32 0.0078125, %v335_v1 }
  0xf2   : > { %v338_v3 = vsub.f32 %v1195_v0, %v337_v2 }
  0xf4   : > { %v339_v4 = vmul.f32 %v338_v3, %v338_v3  ;;  %v361_v23 = vmul.f32 %v670_v22, %v338_v3 }
  0xf6   : > { %340 = vadd.xlane.f32.xlu0 %v339_v4 }
 0x183   : > { %v341_v14 = vpop.xlane.xlu0 %340 }
 0x184   : > { %v343_v15 = vmul.f32 0.007874016, %v341_v14 }
 0x186   : > { %806 = vrsqrt.f32 %v343_v15  ;;  %vm346_vm1 = vcmp.eq.f32.partialorder %v343_v15, inf  ;;  %v349_v18 = vand.u32 2147483648, %v343_v15  ;;  %vm348_vm2 = vcmp.eq.f32.partialorder %v343_v15, 0.0 }
 0x190   : > { %v807_v16 = vpop.eup %806 }
 0x191   : > { %v345_v17 = vmul.f32 %v807_v16, %v343_v15 }
 0x193   : > { %v347_v19 = vsel %vm346_vm1, %v343_v15, %v345_v17 }
 0x194   : > { %v350_v20 = vsel %vm348_vm2, %v349_v18, %v347_v19 }
 0x195   : > { %v351_v21 = vadd.f32 1e-07, %v350_v20 }
 0x197   : > { %808 = vrcp.f32 %v351_v21 }
 0x1a1   : > { %v809_v24 = vpop.eup %808 }
 0x1a2   : > { %v362_v26 = vmul.f32 %v809_v24, %v361_v23 }
 0x1a4   : > { %v370_v27 = vadd.f32 %v671_v25, %v362_v26 }
 0x1a6   : > { %v372_v28 = vpack.c.bf16 %v370_v27, %v370_v27  ;;  %371 = vst [vmem:[%s324_s15] sm:$0xff] %v370_v27 }
 0x1a8   : > { %373 = vst [vmem:[#allocation2] sm:$0xf] %v372_v28 }
 0x1af   : > { %v374_v29 = vld [vmem:[#allocation2] sm:$0xf] }
 0x1b0   : > { %713 = vmatmul.mubr.bf16.vlgmr.msra.gmra.mrb[0].mxu0 %v374_v29 }
 0x1b1   : > { %881 = shalt.err (!%p878_p5)
}
 0x1b2   : > { %s882_s9 = scalar_lea.hbm %s1212_s30, 128  ;;  %s886_s16 = scalar_lea.hbm %s1297_s6, 256 }
 0x1b3   : > { %p883_p9 = scmp.ne.s32.totalorder %s1212_s30, %s882_s9  ;;  %p887_p7 = scmp.lt.u32.totalorder %s1212_s30, %s1297_s6 }
 0x1b4   : > { %p888_p3 = scmp.lt.u32.totalorder %s886_s16, %s882_s9  ;;  %p890_p4 = scmp.lt.u32.totalorder %s882_s9, %s1212_s30 }
 0x1b5   : > { %p884_p1 = pnand %p883_p9, %p1127_p10 }
 0x1b6   : > { %p889_p13 = por %p888_p3, %p887_p7 }
 0x1b7   : > { %p885_p2 = pneg %p884_p1 }
 0x1b8   : > { %p891_p6 = por %p890_p4, %p889_p13 }
 0x1ba   : > { %p892_p8 = pnand %p891_p6, %p885_p2 }
 0x1bc   : > { %895 = shalt.err (!%p892_p8)
}
 0x1bd   : > { %723 = dma.vmem_to_hbm [thread:$0]  (%p1127_p10), %s523_s19, 128, %s1212_s30, %s495_s27   ;;  %v672_v30 = vld [vmem:[%s1295_s4] ss:$0 sm:$0xff] }
 0x1be   : > { %s317_s7 = scalar_lea.vmem [#allocation8], %s1183_s28  ;;  %s1242_s16 = scalar_lea.hbm %s1296_s5, %s683_s12 }
 0x1bf   : > { %s509_s14 = sshll.u32 %s317_s7, 4  ;;  %s490_s28 = scalar_lea.sflag [#allocation5], %s1180_s3  ;;  %s1244_s14 = int_to_ptr.vmem [resolvable:$true] %s509_s14 }
 0x1c0   : > { %s896_s30 = scalar_lea.vmem %s1244_s14, 128  ;;  %s995_s19 = smov [#allocation8]  }
 0x1c1   : > { %p897_p12 = scmp.ne.s32.totalorder %s1244_s14, %s896_s30  ;;  %s900_s27 = sshll.u32 %s995_s19, 4  ;;  %s901_s27 = int_to_ptr.vmem [resolvable:$false] %s900_s27 }
 0x1c2   : > { %s902_s24 = scalar_lea.vmem %s901_s27, 256  ;;  %p903_p5 = scmp.lt.s32.totalorder %s1244_s14, %s901_s27 }
 0x1c3   : > { %p898_p11 = pnand %p897_p12, %p1127_p10  ;;  %p904_p9 = scmp.lt.s32.totalorder %s902_s24, %s896_s30 }
 0x1c5   : > { %p899_p0 = pneg %p898_p11  ;;  %p905_p1 = por %p904_p9, %p903_p5 }
 0x1c7   : > { %p906_p2 = pnand %p905_p1, %p899_p0 }
 0x283   : > { %v480_v31 = vpop.f32.mrb[0].mxu0 }
 0x284   : > { %v481_v32 = vadd.f32 %v672_v30, %v480_v31  ;;  %v714_v33 = vpop.f32.mrb[1].mxu0 }
 0x285   : > { %v483_v34 = vpop.f32.mrb[2].mxu0 }
 0x286   : > { %v487_v35 = vadd.f32 %v481_v32, %v1195_v0  ;;  %v715_v36 = vpop.f32.mrb[3].mxu0 }
 0x288   : > { %488 = vst [vmem:[%s317_s7] sm:$0xff] %v487_v35 }
 0x289   : > { %909 = shalt.err (!%p906_p2)
}
 0x28a   : > { %s910_s3 = scalar_lea.hbm %s1242_s16, 128  ;;  %s914_s10 = scalar_lea.hbm %s1296_s5, 256 }
 0x28b   : > { %p911_p7 = scmp.ne.s32.totalorder %s1242_s16, %s910_s3  ;;  %p915_p4 = scmp.lt.u32.totalorder %s1242_s16, %s1296_s5 }
 0x28c   : > { %p916_p6 = scmp.lt.u32.totalorder %s914_s10, %s910_s3  ;;  %p918_p12 = scmp.lt.u32.totalorder %s910_s3, %s1242_s16 }
 0x28d   : > { %p912_p3 = pnand %p911_p7, %p1127_p10 }
 0x28e   : > { %p917_p8 = por %p916_p6, %p915_p4 }
 0x28f   : > { %p913_p13 = pneg %p912_p3 }
 0x290   : > { %p919_p11 = por %p918_p12, %p917_p8 }
 0x292   : > { %p920_p0 = pnand %p919_p11, %p913_p13 }
 0x294   : > { %923 = shalt.err (!%p920_p0)
}
 0x295   : > { %722 = dma.vmem_to_hbm [thread:$0]  (%p1127_p10), %s1244_s14, 128, %s1242_s16, %s490_s28  }
 0x296 PF: > { %s534_s7 = sand.u32 1, %s966_s21   ;;  %p1317_p5 = scmp.ne.s32.totalorder %s1306_s8, 0 }
 0x297   : > { %p1318_p9 = scmp.ge.s32.totalorder %s986_s26, 2  ;;  %s535_s9 = scalar_lea.sflag [#allocation5], %s534_s7 }
 0x299   : > { %p735_p1 = pnand %p1318_p9, %p1317_p5 }
 0x29b   : > { %957 = dma.done.wait (!%p735_p1), %s535_s9, 128  }
 0x29c   : > { %959 = vsyncadd (!%p735_p1), %s535_s9, 4294967168  ;;  %s544_s15 = scalar_lea.sflag [#allocation10], %s534_s7 }
 0x29d   : > { %961 = dma.done.wait (!%p735_p1), %s544_s15, 128  }
 0x29e   : > { %963 = vsyncadd (!%p735_p1), %s544_s15, 4294967168  ;;  %s27_s26 = sadd.s32 1, %s986_s26   ;;  %s1319_s21 = smov %s970_s22 }
 0x29f   : > { %p24_p2 = scmp.ge.s32.totalorder %s27_s26, 4   ;;  %s1320_s22 = smov %s974_s23 }
 0x2a0   : > { %s1321_s23 = smov %s1136_s20  ;;  %s1322_s24 = smov %s982_s25 }
 0x2a1   : > { %s1323_s25 = smov %s1325_s13  ;;  %26 = sbr.rel (!%p24_p2) target bundleno = 11 (0xb), region = 114 }
 0x2a8   :  { %549 = vsyncpa [#allocation4], 1 }
 0x2a9   :  { %551 = vsyncpa [#allocation4 + $0x1], 1 }
 0x2aa   :  { %552 = vsyncpa [#allocation7], 1 }
 0x2ab   :  { %553 = vsyncpa [#allocation5], 1 }
 0x2ac   :  { %555 = vsyncpa [#allocation5 + $0x1], 1 }
 0x2ad   :  { %556 = vsyncpa [#allocation10], 1 }
 0x2ae   :  { %558 = vsyncpa [#allocation10 + $0x1], 1 }

</bundles_post_ra>
